<compile_context>
chip_gen: v5e
topology: v5e:2x2
jax: 0.10.0
libtpu: 0.0.40
codegen_flags: <defaults>
</compile_context>

<pallas_src>
import jax
import jax.numpy as jnp
from jax import lax
from jax.experimental import pallas as pl
from jax.experimental.pallas import tpu as pltpu

LANE = 128
SUBLANE = 8
NEG_MASK = -1e30  # bias value for padded vocab lanes (exp underflows to 0)


def _round_up(x, m):
    return (x + m - 1) // m * m


# ---------------------------------------------------------------------------
# Kernel: T teacher-forced GRU decode steps, ONE grid step, in-kernel time loop.
# ---------------------------------------------------------------------------
def gru_decoder_kernel(
    tok_ref,        # SMEM scalar prefetch: (T,) int32 token ids
    emb_ref,        # (V, Hp)     embedding table (relu applied in-kernel)
    wih_ref,        # (Hp, 3*Hp)  input->gates, columns [r|z|n]
    whh_ref,        # (Hp, 3*Hp)  hidden->gates, columns [r|z|n]
    bi_ref,         # (1, 3*Hp)   [b_ir+b_hr | b_iz+b_hz | b_in]
    bhn_ref,        # (1, Hp)     b_hn (kept separate: lives inside r*(...))
    wout_ref,       # (Hp, Vp)    output projection
    bout_ref,       # (1, Vp)     output bias, padded lanes = -1e30
    h0_ref,         # (1, Hp)     initial hidden
    logp_ref,       # out (Tp, Vp) log-probs (rows >= T are padding)
    hout_ref,       # out (1, Hp)  final hidden state
    x_scr,          # scratch (Tp, Hp)    relu(embedding) rows
    gi_scr,         # scratch (Tp, 3*Hp)  input-side gate pre-activations
    h_scr,          # scratch (Tp, Hp)    per-step hidden states
):
    T = tok_ref.shape[0]            # static trip count
    Hp = h_scr.shape[-1]

    x_scr[...] = jnp.zeros_like(x_scr)
    h_scr[...] = jnp.zeros_like(h_scr)

    # 1) Gather + relu the embeddings for all tokens (off the serial path).
    def gather(t, carry):
        x_scr[pl.ds(t, 1), :] = emb_ref[pl.ds(tok_ref[t], 1), :]
        return carry

    lax.fori_loop(0, T, gather, 0, unroll=True)
    x = jnp.maximum(x_scr[...], 0.0)                       # (Tp, Hp)

    # 2) Batched input-side gate projection: one (Tp,Hp)@(Hp,3Hp) MXU matmul.
    gi_scr[...] = (
        jnp.dot(x, wih_ref[...], preferred_element_type=jnp.float32) + bi_ref[...]
    )

    # 3) Serial GRU recurrence: only h @ W_hh + elementwise gate math per step.
    def step(t, h):
        gh = jnp.dot(h, whh_ref[...], preferred_element_type=jnp.float32)  # (1,3Hp)
        gi = gi_scr[pl.ds(t, 1), :]                                        # (1,3Hp)
        r = jax.nn.sigmoid(gi[:, 0 * Hp:1 * Hp] + gh[:, 0 * Hp:1 * Hp])
        z = jax.nn.sigmoid(gi[:, 1 * Hp:2 * Hp] + gh[:, 1 * Hp:2 * Hp])
        n = jnp.tanh(gi[:, 2 * Hp:3 * Hp] + r * (gh[:, 2 * Hp:3 * Hp] + bhn_ref[...]))
        h_new = (1.0 - z) * n + z * h
        h_scr[pl.ds(t, 1), :] = h_new
        return h_new

    h_last = lax.fori_loop(0, T, step, h0_ref[...], unroll=True)
    hout_ref[...] = h_last

    # 4) Batched output projection + log_softmax; ONE tile-dense (Tp,Vp) store.
    #    Padded vocab lanes carry a -1e30 bias so they vanish in the softmax.
    logits = (
        jnp.dot(h_scr[...], wout_ref[...], preferred_element_type=jnp.float32)
        + bout_ref[...]
    )
    m = jnp.max(logits, axis=-1, keepdims=True)
    shifted = logits - m
    lse = jnp.log(jnp.sum(jnp.exp(shifted), axis=-1, keepdims=True))
    logp_ref[...] = shifted - lse


# ---------------------------------------------------------------------------
# Parameter init (raw PyTorch-layout params) and one-time packing.
# ---------------------------------------------------------------------------
def init_decoder_params(key, hidden_size, output_size):
    H, V = hidden_size, output_size
    ks = jax.random.split(key, 7)
    s = 0.1
    return {
        "hidden_size": H,
        "output_size": V,
        "embedding": jax.random.normal(ks[0], (V, H), jnp.float32) * s,
        "w_ih": jax.random.normal(ks[1], (3 * H, H), jnp.float32) * s,  # rows [r|z|n]
        "w_hh": jax.random.normal(ks[2], (3 * H, H), jnp.float32) * s,
        "b_ih": jax.random.normal(ks[3], (3 * H,), jnp.float32) * s,
        "b_hh": jax.random.normal(ks[4], (3 * H,), jnp.float32) * s,
        "w_out": jax.random.normal(ks[5], (V, H), jnp.float32) * s,
        "b_out": jax.random.normal(ks[6], (V,), jnp.float32) * s,
    }


def pack_decoder_params(params):
    """One-time transpose / fuse / pad of all weights (done at init, not per step)."""
    H, V = params["hidden_size"], params["output_size"]
    Hp, Vp = _round_up(H, LANE), _round_up(V, LANE)
    w_ih, w_hh = params["w_ih"], params["w_hh"]
    b_ih, b_hh = params["b_ih"], params["b_hh"]

    w_ih_T = jnp.zeros((Hp, 3 * Hp), jnp.float32)
    w_hh_T = jnp.zeros((Hp, 3 * Hp), jnp.float32)
    for g in range(3):  # gate order r, z, n
        w_ih_T = w_ih_T.at[:H, g * Hp:g * Hp + H].set(w_ih[g * H:(g + 1) * H, :].T)
        w_hh_T = w_hh_T.at[:H, g * Hp:g * Hp + H].set(w_hh[g * H:(g + 1) * H, :].T)

    b_i = jnp.zeros((1, 3 * Hp), jnp.float32)
    b_i = b_i.at[0, 0:H].set(b_ih[0:H] + b_hh[0:H])                    # r (folded)
    b_i = b_i.at[0, Hp:Hp + H].set(b_ih[H:2 * H] + b_hh[H:2 * H])      # z (folded)
    b_i = b_i.at[0, 2 * Hp:2 * Hp + H].set(b_ih[2 * H:3 * H])          # n (input half)
    b_hn = jnp.zeros((1, Hp), jnp.float32).at[0, :H].set(b_hh[2 * H:3 * H])

    emb = jnp.zeros((V, Hp), jnp.float32).at[:, :H].set(params["embedding"])
    w_out_T = jnp.zeros((Hp, Vp), jnp.float32).at[:H, :V].set(params["w_out"].T)
    b_out = jnp.full((1, Vp), NEG_MASK, jnp.float32).at[0, :V].set(params["b_out"])

    return {"Hp": Hp, "Vp": Vp, "embedding": emb, "w_ih_T": w_ih_T,
            "w_hh_T": w_hh_T, "b_i": b_i, "b_hn": b_hn,
            "w_out_T": w_out_T, "b_out": b_out}


# ---------------------------------------------------------------------------
# Wrappers
# ---------------------------------------------------------------------------
def _decode_seq_padded(packed, tokens, h0_p):
    Hp, Vp = packed["Hp"], packed["Vp"]
    T = int(tokens.shape[0])
    Tp = _round_up(T, SUBLANE)       # tile-dense output block (sublane multiple)
    inputs = (packed["embedding"], packed["w_ih_T"], packed["w_hh_T"],
              packed["b_i"], packed["b_hn"], packed["w_out_T"], packed["b_out"],
              h0_p)

    def const_spec(a):
        return pl.BlockSpec(a.shape, lambda i, tok: (0, 0))   # all inputs are 2-D

    grid_spec = pltpu.PrefetchScalarGridSpec(
        num_scalar_prefetch=1,
        grid=(1,),                                # single grid step; time loop in-kernel
        in_specs=[const_spec(a) for a in inputs],
        out_specs=(pl.BlockSpec((Tp, Vp), lambda i, tok: (0, 0)),
                   pl.BlockSpec((1, Hp), lambda i, tok: (0, 0))),
        scratch_shapes=[pltpu.VMEM((Tp, Hp), jnp.float32),       # relu(embeddings)
                        pltpu.VMEM((Tp, 3 * Hp), jnp.float32),   # input-side gates
                        pltpu.VMEM((Tp, Hp), jnp.float32)],      # hidden states
    )
    logp_p, h_p = pl.pallas_call(
        gru_decoder_kernel,
        out_shape=(jax.ShapeDtypeStruct((Tp, Vp), jnp.float32),
                   jax.ShapeDtypeStruct((1, Hp), jnp.float32)),
        grid_spec=grid_spec,
        compiler_params=pltpu.CompilerParams(dimension_semantics=("arbitrary",)),
    )(tokens, *inputs)
    return logp_p, h_p


def decoder_forward_seq(params, packed, tokens, hidden):
    """Teacher-forced T-step decode fused in a single pallas_call.
    tokens: (T,) int; hidden: (1,1,H). Returns (log_probs (T,V), hidden (1,1,H))."""
    H, V = params["hidden_size"], params["output_size"]
    Hp = packed["Hp"]
    T = int(tokens.shape[0])
    h0_p = jnp.zeros((1, Hp), jnp.float32).at[:, :H].set(hidden.reshape(1, H))
    logp_p, h_p = _decode_seq_padded(packed, tokens.reshape(-1).astype(jnp.int32), h0_p)
    return logp_p[:T, :V], h_p[:, :H].reshape(1, 1, H)


def decoder_forward(params, packed, input_token, hidden):
    """Single-step forward matching DecoderRNN.forward(input, hidden):
    input_token (1,1) int, hidden (1,1,H) -> (log_probs (1,V), hidden (1,1,H))."""
    return decoder_forward_seq(params, packed, input_token.reshape(-1), hidden)


# ---------------------------------------------------------------------------
# Pure-JAX references (mirror PyTorch semantics exactly, use raw params)
# ---------------------------------------------------------------------------
def decoder_forward_ref(params, input_token, hidden):
    H, V = params["hidden_size"], params["output_size"]
    x = jnp.maximum(params["embedding"][input_token.reshape(-1)].reshape(1, H), 0.0)
    h = hidden.reshape(1, H)
    gi = x @ params["w_ih"].T + params["b_ih"]
    gh = h @ params["w_hh"].T + params["b_hh"]
    r = jax.nn.sigmoid(gi[:, 0:H] + gh[:, 0:H])
    z = jax.nn.sigmoid(gi[:, H:2 * H] + gh[:, H:2 * H])
    n = jnp.tanh(gi[:, 2 * H:] + r * gh[:, 2 * H:])
    h_new = (1.0 - z) * n + z * h
    logits = h_new @ params["w_out"].T + params["b_out"]
    return jax.nn.log_softmax(logits, axis=1), h_new.reshape(1, 1, H)


def decoder_forward_seq_ref(params, tokens, hidden):
    logps, h = [], hidden
    for t in range(tokens.shape[0]):
        logp, h = decoder_forward_ref(params, tokens[t].reshape(1, 1), h)
        logps.append(logp)
    return jnp.concatenate(logps, axis=0), h


if __name__ == "__main__":
    hidden_size = 32
    output_size = 64   # vocab size

    key = jax.random.PRNGKey(0)
    kp, kh, kt = jax.random.split(key, 3)
    params = init_decoder_params(kp, hidden_size, output_size)
    packed = pack_decoder_params(params)   # one-time weight packing

    input_token = jnp.array([[3]], dtype=jnp.int32)                    # (1, 1)
    hidden = jax.random.normal(kh, (1, 1, hidden_size), jnp.float32)   # (1, 1, H)

    # ---- single-step forward (module semantics) ----
    logp, h_new = decoder_forward(params, packed, input_token, hidden)
    logp = jax.block_until_ready(logp)
    h_new = jax.block_until_ready(h_new)
    logp_ref, h_ref = decoder_forward_ref(params, input_token, hidden)
    assert logp.shape == (1, output_size) and h_new.shape == (1, 1, hidden_size)
    assert jnp.allclose(logp, logp_ref, atol=1e-5, rtol=1e-5)
    assert jnp.allclose(h_new, h_ref, atol=1e-5, rtol=1e-5)

    # ---- fused multi-step (teacher-forced) decode: one pallas_call, one grid step ----
    T = 8
    tokens = jax.random.randint(kt, (T,), 0, output_size, dtype=jnp.int32)
    logp_seq, h_seq = decoder_forward_seq(params, packed, tokens, hidden)
    logp_seq = jax.block_until_ready(logp_seq)
    h_seq = jax.block_until_ready(h_seq)
    logp_seq_ref, h_seq_ref = decoder_forward_seq_ref(params, tokens, hidden)
    assert logp_seq.shape == (T, output_size)
    assert jnp.allclose(logp_seq, logp_seq_ref, atol=1e-4, rtol=1e-4)
    assert jnp.allclose(h_seq, h_seq_ref, atol=1e-4, rtol=1e-4)

    print("KERNEL_OK")
</pallas_src>

<mosaic_0001>
module attributes {stable_mosaic.version = 11 : i64} {
  func.func @gru_decoder_kernel(%arg0: i32, %arg1: memref<1xi32, #tpu.memory_space<smem>>, %arg2: memref<64x128xf32, #tpu.memory_space<vmem>>, %arg3: memref<128x384xf32, #tpu.memory_space<vmem>>, %arg4: memref<128x384xf32, #tpu.memory_space<vmem>>, %arg5: memref<1x384xf32, #tpu.memory_space<vmem>>, %arg6: memref<1x128xf32, #tpu.memory_space<vmem>>, %arg7: memref<128x128xf32, #tpu.memory_space<vmem>>, %arg8: memref<1x128xf32, #tpu.memory_space<vmem>>, %arg9: memref<1x128xf32, #tpu.memory_space<vmem>>, %arg10: memref<8x128xf32, #tpu.memory_space<vmem>>, %arg11: memref<1x128xf32, #tpu.memory_space<vmem>>, %arg12: memref<8x128xf32, #tpu.memory_space<vmem>>, %arg13: memref<8x384xf32, #tpu.memory_space<vmem>>, %arg14: memref<8x128xf32, #tpu.memory_space<vmem>>) attributes {dimension_semantics = [#tpu.dimension_semantics<arbitrary>], iteration_bounds = array<i64: 1>, scalar_prefetch = 1 : i64, scratch_operands = 3 : i64, tpu.core_type = #tpu.core_type<tc>, window_params = [{pipeline_mode = #tpu.pipeline_mode<synchronous>, transform_indices = @transform_0, window_bounds = array<i64: 64, 128>}, {pipeline_mode = #tpu.pipeline_mode<synchronous>, transform_indices = @transform_1, window_bounds = array<i64: 128, 384>}, {pipeline_mode = #tpu.pipeline_mode<synchronous>, transform_indices = @transform_2, window_bounds = array<i64: 128, 384>}, {pipeline_mode = #tpu.pipeline_mode<synchronous>, transform_indices = @transform_3, window_bounds = array<i64: 1, 384>}, {pipeline_mode = #tpu.pipeline_mode<synchronous>, transform_indices = @transform_4, window_bounds = array<i64: 1, 128>}, {pipeline_mode = #tpu.pipeline_mode<synchronous>, transform_indices = @transform_5, window_bounds = array<i64: 128, 128>}, {pipeline_mode = #tpu.pipeline_mode<synchronous>, transform_indices = @transform_6, window_bounds = array<i64: 1, 128>}, {pipeline_mode = #tpu.pipeline_mode<synchronous>, transform_indices = @transform_7, window_bounds = array<i64: 1, 128>}, {pipeline_mode = #tpu.pipeline_mode<synchronous>, transform_indices = @transform_8, window_bounds = array<i64: 8, 128>}, {pipeline_mode = #tpu.pipeline_mode<synchronous>, transform_indices = @transform_9, window_bounds = array<i64: 1, 128>}]} {
    %cst = arith.constant 0.000000e+00 : f32
    %0 = vector.broadcast %cst : f32 to vector<8x128xf32>
    %c0 = arith.constant 0 : index
    %c0_0 = arith.constant 0 : index
    %1 = vector.load %arg12[%c0, %c0_0] : memref<8x128xf32, #tpu.memory_space<vmem>>, vector<8x128xf32>
    tpu.vector_store %arg12[%c0, %c0_0], %0 {strides = array<i32>} : memref<8x128xf32, #tpu.memory_space<vmem>>, vector<8x128xf32>,
    %cst_1 = arith.constant 0.000000e+00 : f32
    %2 = vector.broadcast %cst_1 : f32 to vector<8x128xf32>
    %c0_2 = arith.constant 0 : index
    %c0_3 = arith.constant 0 : index
    %3 = vector.load %arg14[%c0_2, %c0_3] : memref<8x128xf32, #tpu.memory_space<vmem>>, vector<8x128xf32>
    tpu.vector_store %arg14[%c0_2, %c0_3], %2 {strides = array<i32>} : memref<8x128xf32, #tpu.memory_space<vmem>>, vector<8x128xf32>,
    %c0_i32 = arith.constant 0 : i32
    %4 = arith.index_cast %c0_i32 : i32 to index
    %5 = memref.load %arg1[%4] : memref<1xi32, #tpu.memory_space<smem>>
    %6 = arith.index_cast %5 : i32 to index
    %c0_4 = arith.constant 0 : index
    %7 = vector.load %arg2[%6, %c0_4] : memref<64x128xf32, #tpu.memory_space<vmem>>, vector<1x128xf32>
    %8 = arith.index_cast %c0_i32 : i32 to index
    %c0_5 = arith.constant 0 : index
    %9 = vector.load %arg12[%8, %c0_5] : memref<8x128xf32, #tpu.memory_space<vmem>>, vector<1x128xf32>
    tpu.vector_store %arg12[%8, %c0_5], %7 {strides = array<i32>} : memref<8x128xf32, #tpu.memory_space<vmem>>, vector<1x128xf32>,
    %c1_i32 = arith.constant 1 : i32
    %c0_6 = arith.constant 0 : index
    %c0_7 = arith.constant 0 : index
    %10 = vector.load %arg12[%c0_6, %c0_7] : memref<8x128xf32, #tpu.memory_space<vmem>>, vector<8x128xf32>
    %cst_8 = arith.constant 0.000000e+00 : f32
    %11 = vector.broadcast %cst_8 : f32 to vector<8x128xf32>
    %12 = arith.maximumf %10, %11 : vector<8x128xf32>
    %c0_9 = arith.constant 0 : index
    %c0_10 = arith.constant 0 : index
    %13 = vector.load %arg3[%c0_9, %c0_10] : memref<128x384xf32, #tpu.memory_space<vmem>>, vector<128x384xf32>
    %cst_11 = arith.constant dense<0.000000e+00> : vector<8x384xf32>
    %14 = tpu.matmul %12, %13, %cst_11 {dimension_numbers = #tpu.dot_dimension_numbers<[1], [0], [0], [1], [0, 0, 1, 1], [], []>} : vector<8x128xf32>, vector<128x384xf32>, vector<8x384xf32> -> vector<8x384xf32>
    %c0_12 = arith.constant 0 : index
    %c0_13 = arith.constant 0 : index
    %15 = vector.load %arg5[%c0_12, %c0_13] : memref<1x384xf32, #tpu.memory_space<vmem>>, vector<1x384xf32>
    %16 = vector.broadcast %15 : vector<1x384xf32> to vector<8x384xf32>
    %17 = arith.addf %14, %16 : vector<8x384xf32>
    %c0_14 = arith.constant 0 : index
    %c0_15 = arith.constant 0 : index
    %18 = vector.load %arg13[%c0_14, %c0_15] : memref<8x384xf32, #tpu.memory_space<vmem>>, vector<8x384xf32>
    tpu.vector_store %arg13[%c0_14, %c0_15], %17 {strides = array<i32>} : memref<8x384xf32, #tpu.memory_space<vmem>>, vector<8x384xf32>,
    %c0_16 = arith.constant 0 : index
    %c0_17 = arith.constant 0 : index
    %19 = vector.load %arg9[%c0_16, %c0_17] : memref<1x128xf32, #tpu.memory_space<vmem>>, vector<1x128xf32>
    %c0_i32_18 = arith.constant 0 : i32
    %c0_19 = arith.constant 0 : index
    %c0_20 = arith.constant 0 : index
    %20 = vector.load %arg4[%c0_19, %c0_20] : memref<128x384xf32, #tpu.memory_space<vmem>>, vector<128x384xf32>
    %cst_21 = arith.constant dense<0.000000e+00> : vector<1x384xf32>
    %21 = tpu.matmul %19, %20, %cst_21 {dimension_numbers = #tpu.dot_dimension_numbers<[1], [0], [0], [1], [0, 0, 1, 1], [], []>} : vector<1x128xf32>, vector<128x384xf32>, vector<1x384xf32> -> vector<1x384xf32>
    %22 = arith.index_cast %c0_i32_18 : i32 to index
    %c0_22 = arith.constant 0 : index
    %23 = vector.load %arg13[%22, %c0_22] : memref<8x384xf32, #tpu.memory_space<vmem>>, vector<1x384xf32>
    %24 = vector.extract_strided_slice %23 {offsets = [0, 0], sizes = [1, 128], strides = [1, 1]} : vector<1x384xf32> to vector<1x128xf32>
    %25 = vector.extract_strided_slice %21 {offsets = [0, 0], sizes = [1, 128], strides = [1, 1]} : vector<1x384xf32> to vector<1x128xf32>
    %26 = arith.addf %24, %25 : vector<1x128xf32>
    %27 = arith.negf %26 : vector<1x128xf32>
    %28 = math.exp %27 : vector<1x128xf32>
    %cst_23 = arith.constant 1.000000e+00 : f32
    %29 = vector.broadcast %cst_23 : f32 to vector<1x128xf32>
    %30 = arith.addf %29, %28 : vector<1x128xf32>
    %31 = arith.divf %29, %30 : vector<1x128xf32>
    %32 = vector.extract_strided_slice %23 {offsets = [0, 128], sizes = [1, 128], strides = [1, 1]} : vector<1x384xf32> to vector<1x128xf32>
    %33 = vector.extract_strided_slice %21 {offsets = [0, 128], sizes = [1, 128], strides = [1, 1]} : vector<1x384xf32> to vector<1x128xf32>
    %34 = arith.addf %32, %33 : vector<1x128xf32>
    %35 = arith.negf %34 : vector<1x128xf32>
    %36 = math.exp %35 : vector<1x128xf32>
    %cst_24 = arith.constant 1.000000e+00 : f32
    %37 = vector.broadcast %cst_24 : f32 to vector<1x128xf32>
    %38 = arith.addf %37, %36 : vector<1x128xf32>
    %39 = arith.divf %37, %38 : vector<1x128xf32>
    %40 = vector.extract_strided_slice %23 {offsets = [0, 256], sizes = [1, 128], strides = [1, 1]} : vector<1x384xf32> to vector<1x128xf32>
    %41 = vector.extract_strided_slice %21 {offsets = [0, 256], sizes = [1, 128], strides = [1, 1]} : vector<1x384xf32> to vector<1x128xf32>
    %c0_25 = arith.constant 0 : index
    %c0_26 = arith.constant 0 : index
    %42 = vector.load %arg6[%c0_25, %c0_26] : memref<1x128xf32, #tpu.memory_space<vmem>>, vector<1x128xf32>
    %43 = arith.addf %41, %42 : vector<1x128xf32>
    %44 = arith.mulf %31, %43 : vector<1x128xf32>
    %45 = arith.addf %40, %44 : vector<1x128xf32>
    %46 = math.tanh %45 : vector<1x128xf32>
    %cst_27 = arith.constant 1.000000e+00 : f32
    %47 = vector.broadcast %cst_27 : f32 to vector<1x128xf32>
    %48 = arith.subf %47, %39 : vector<1x128xf32>
    %49 = arith.mulf %48, %46 : vector<1x128xf32>
    %50 = arith.mulf %39, %19 : vector<1x128xf32>
    %51 = arith.addf %49, %50 : vector<1x128xf32>
    %52 = arith.index_cast %c0_i32_18 : i32 to index
    %c0_28 = arith.constant 0 : index
    %53 = vector.load %arg14[%52, %c0_28] : memref<8x128xf32, #tpu.memory_space<vmem>>, vector<1x128xf32>
    tpu.vector_store %arg14[%52, %c0_28], %51 {strides = array<i32>} : memref<8x128xf32, #tpu.memory_space<vmem>>, vector<1x128xf32>,
    %c1_i32_29 = arith.constant 1 : i32
    %c0_30 = arith.constant 0 : index
    %c0_31 = arith.constant 0 : index
    %54 = vector.load %arg11[%c0_30, %c0_31] : memref<1x128xf32, #tpu.memory_space<vmem>>, vector<1x128xf32>
    tpu.vector_store %arg11[%c0_30, %c0_31], %51 {strides = array<i32>} : memref<1x128xf32, #tpu.memory_space<vmem>>, vector<1x128xf32>,
    %c0_32 = arith.constant 0 : index
    %c0_33 = arith.constant 0 : index
    %55 = vector.load %arg14[%c0_32, %c0_33] : memref<8x128xf32, #tpu.memory_space<vmem>>, vector<8x128xf32>
    %c0_34 = arith.constant 0 : index
    %c0_35 = arith.constant 0 : index
    %56 = vector.load %arg7[%c0_34, %c0_35] : memref<128x128xf32, #tpu.memory_space<vmem>>, vector<128x128xf32>
    %cst_36 = arith.constant dense<0.000000e+00> : vector<8x128xf32>
    %57 = tpu.matmul %55, %56, %cst_36 {dimension_numbers = #tpu.dot_dimension_numbers<[1], [0], [0], [1], [0, 0, 1, 1], [], []>} : vector<8x128xf32>, vector<128x128xf32>, vector<8x128xf32> -> vector<8x128xf32>
    %c0_37 = arith.constant 0 : index
    %c0_38 = arith.constant 0 : index
    %58 = vector.load %arg8[%c0_37, %c0_38] : memref<1x128xf32, #tpu.memory_space<vmem>>, vector<1x128xf32>
    %59 = vector.broadcast %58 : vector<1x128xf32> to vector<8x128xf32>
    %60 = arith.addf %57, %59 : vector<8x128xf32>
    %cst_39 = arith.constant dense<0xFF800000> : vector<8xf32>
    %61 = vector.multi_reduction <maximumf>, %60, %cst_39 [1] : vector<8x128xf32> to vector<8xf32>
    %62 = vector.shape_cast %61 : vector<8xf32> to vector<8x1xf32>
    %63 = vector.broadcast %62 : vector<8x1xf32> to vector<8x128xf32>
    %64 = arith.subf %60, %63 : vector<8x128xf32>
    %65 = math.exp %64 : vector<8x128xf32>
    %cst_40 = arith.constant dense<0.000000e+00> : vector<8xf32>
    %66 = vector.multi_reduction <add>, %65, %cst_40 [1] : vector<8x128xf32> to vector<8xf32>
    %67 = vector.shape_cast %66 : vector<8xf32> to vector<8x1xf32>
    %68 = math.log %67 : vector<8x1xf32>
    %69 = vector.broadcast %68 : vector<8x1xf32> to vector<8x128xf32>
    %70 = arith.subf %64, %69 : vector<8x128xf32>
    %c0_41 = arith.constant 0 : index
    %c0_42 = arith.constant 0 : index
    %71 = vector.load %arg10[%c0_41, %c0_42] : memref<8x128xf32, #tpu.memory_space<vmem>>, vector<8x128xf32>
    tpu.vector_store %arg10[%c0_41, %c0_42], %70 {strides = array<i32>} : memref<8x128xf32, #tpu.memory_space<vmem>>, vector<8x128xf32>,
    return
  }
  func.func @transform_0(%arg0: i32, %arg1: memref<1xi32, #tpu.memory_space<smem>>) -> (i32, i32) {
    %c0_i32 = arith.constant 0 : i32
    %c0_i32_0 = arith.constant 0 : i32
    %c0_i32_1 = arith.constant 0 : i32
    return %c0_i32, %c0_i32_0 : i32, i32
  }
  func.func @transform_1(%arg0: i32, %arg1: memref<1xi32, #tpu.memory_space<smem>>) -> (i32, i32) {
    %c0_i32 = arith.constant 0 : i32
    %c0_i32_0 = arith.constant 0 : i32
    %c0_i32_1 = arith.constant 0 : i32
    return %c0_i32, %c0_i32_0 : i32, i32
  }
  func.func @transform_2(%arg0: i32, %arg1: memref<1xi32, #tpu.memory_space<smem>>) -> (i32, i32) {
    %c0_i32 = arith.constant 0 : i32
    %c0_i32_0 = arith.constant 0 : i32
    %c0_i32_1 = arith.constant 0 : i32
    return %c0_i32, %c0_i32_0 : i32, i32
  }
  func.func @transform_3(%arg0: i32, %arg1: memref<1xi32, #tpu.memory_space<smem>>) -> (i32, i32) {
    %c0_i32 = arith.constant 0 : i32
    %c0_i32_0 = arith.constant 0 : i32
    %c0_i32_1 = arith.constant 0 : i32
    return %c0_i32, %c0_i32_0 : i32, i32
  }
  func.func @transform_4(%arg0: i32, %arg1: memref<1xi32, #tpu.memory_space<smem>>) -> (i32, i32) {
    %c0_i32 = arith.constant 0 : i32
    %c0_i32_0 = arith.constant 0 : i32
    %c0_i32_1 = arith.constant 0 : i32
    return %c0_i32, %c0_i32_0 : i32, i32
  }
  func.func @transform_5(%arg0: i32, %arg1: memref<1xi32, #tpu.memory_space<smem>>) -> (i32, i32) {
    %c0_i32 = arith.constant 0 : i32
    %c0_i32_0 = arith.constant 0 : i32
    %c0_i32_1 = arith.constant 0 : i32
    return %c0_i32, %c0_i32_0 : i32, i32
  }
  func.func @transform_6(%arg0: i32, %arg1: memref<1xi32, #tpu.memory_space<smem>>) -> (i32, i32) {
    %c0_i32 = arith.constant 0 : i32
    %c0_i32_0 = arith.constant 0 : i32
    %c0_i32_1 = arith.constant 0 : i32
    return %c0_i32, %c0_i32_0 : i32, i32
  }
  func.func @transform_7(%arg0: i32, %arg1: memref<1xi32, #tpu.memory_space<smem>>) -> (i32, i32) {
    %c0_i32 = arith.constant 0 : i32
    %c0_i32_0 = arith.constant 0 : i32
    %c0_i32_1 = arith.constant 0 : i32
    return %c0_i32, %c0_i32_0 : i32, i32
  }
  func.func @transform_8(%arg0: i32, %arg1: memref<1xi32, #tpu.memory_space<smem>>) -> (i32, i32) {
    %c0_i32 = arith.constant 0 : i32
    %c0_i32_0 = arith.constant 0 : i32
    %c0_i32_1 = arith.constant 0 : i32
    return %c0_i32, %c0_i32_0 : i32, i32
  }
  func.func @transform_9(%arg0: i32, %arg1: memref<1xi32, #tpu.memory_space<smem>>) -> (i32, i32) {
    %c0_i32 = arith.constant 0 : i32
    %c0_i32_0 = arith.constant 0 : i32
    %c0_i32_1 = arith.constant 0 : i32
    return %c0_i32, %c0_i32_0 : i32, i32
  }
}

</mosaic_0001>

<bundles_post_ra>
// kernel: tpu_custom_call.1
= control target key start
LH: loop header
LB: loop body
LE: loop exit
PB: predicated region body
PF: predicated region fallthrough
CT: control target
= control target key end

     0   :  { %17 = vsyncpa [#allocation8], 0  ;;  %s771_s0 = inlined_call_operand.<no memory space> [shape: s32[1], index: 0, kind: input, shape index: {}]   ;;  %s772_s1 = inlined_call_operand.hbm [shape: f32[64,128], index: 1, kind: input, shape index: {}]   ;;  %s773_s2 = inlined_call_operand.hbm [shape: f32[128,384], index: 2, kind: input, shape index: {}]   ;;  %s774_s3 = inlined_call_operand.hbm [shape: f32[128,384], index: 3, kind: input, shape index: {}]   ;;  %s775_s4 = inlined_call_operand.vmem [shape: f32[1,384], index: 4, kind: input, shape index: {}]   ;;  %s776_s5 = inlined_call_operand.vmem [shape: f32[1,128], index: 5, kind: input, shape index: {}]   ;;  %s777_s6 = inlined_call_operand.hbm [shape: f32[128,128], index: 6, kind: input, shape index: {}]   ;;  %s778_s7 = inlined_call_operand.vmem [shape: f32[1,128], index: 7, kind: input, shape index: {}]   ;;  %s779_s8 = inlined_call_operand.vmem [shape: f32[1,128], index: 8, kind: input, shape index: {}]   ;;  %s780_s9 = inlined_call_operand.hbm [shape: f32[8,128], index: 9, kind: output, shape index: {0}]   ;;  %s781_s10 = inlined_call_operand.hbm [shape: f32[1,128], index: 10, kind: output, shape index: {1}]  }
   0x1   :  { %18 = vsyncpa [#allocation11], 0 }
   0x2   :  { %19 = vsyncpa [#allocation14], 0 }
   0x3   :  { %20 = vsyncpa [#allocation9], 0  ;;  %s39_s15 = sshll.u32 %s773_s2, 4  ;;  %s40_s15 = int_to_ptr.hbm [resolvable:$true] %s39_s15 }
   0x4   :  { %21 = vsyncpa [#allocation17], 0  ;;  %s661_s16 = smov [#allocation10]   ;;  %s26_s20 = sshll.u32 %s772_s1, 4  ;;  %s27_s20 = int_to_ptr.hbm [resolvable:$true] %s26_s20 }
   0x5   :  { %s41_s17 = sshll.u32 %s661_s16, 4  ;;  %s662_s21 = smov 384   ;;  %s42_s17 = int_to_ptr.vmem [resolvable:$true] %s41_s17 }
   0x6   :  { %s663_s22 = smov 24   ;;  %s664_s23 = smov [#allocation7]  }
   0x7   :  { %47 = dma.hbm_to_vmem [thread:$0]  %s40_s15, 6144, %s42_s17, [#allocation11], %s662_s21, %s662_s21, %s663_s22  }
   0x8   :  { %s28_s24 = sshll.u32 %s664_s23, 4  ;;  %s665_s25 = smov 128   ;;  %s29_s24 = int_to_ptr.vmem [resolvable:$true] %s28_s24 }
   0x9   :  { %s666_s26 = smov 8   ;;  %s52_s28 = sshll.u32 %s774_s3, 4  ;;  %s53_s28 = int_to_ptr.hbm [resolvable:$true] %s52_s28 }
   0xa   :  { %34 = dma.hbm_to_vmem [thread:$0]  %s27_s20, 1024, %s29_s24, [#allocation8], %s665_s25, %s665_s25, %s666_s26  }
   0xb   :  { %s667_s29 = smov [#allocation12]   ;;  %s69_s12 = sshll.u32 %s777_s6, 4  ;;  %s70_s12 = int_to_ptr.hbm [resolvable:$true] %s69_s12 }
   0xc   :  { %s54_s30 = sshll.u32 %s667_s29, 4  ;;  %s668_s13 = smov [#allocation13]   ;;  %s55_s30 = int_to_ptr.vmem [resolvable:$true] %s54_s30 }
   0xd   :  { %60 = dma.hbm_to_vmem [thread:$0]  %s53_s28, 6144, %s55_s30, [#allocation11], %s662_s21, %s662_s21, %s663_s22  }
   0xe   :  { %s71_s14 = sshll.u32 %s668_s13, 4  ;;  %s72_s14 = int_to_ptr.vmem [resolvable:$true] %s71_s14 }
   0xf   :  { %77 = dma.hbm_to_vmem [thread:$0]  %s70_s12, 2048, %s72_s14, [#allocation14], %s665_s25, %s665_s25, %s666_s26  }
  0x10   :  { %651 = dma.done.wait [#allocation8], 1024  }
  0x11   :  { %652 = vsyncadd [#allocation8], 4294966272 }
  0x12   :  { %653 = dma.done.wait [#allocation11], 12288  }
  0x13   :  { %654 = vsyncadd [#allocation11], 4294955008 }
  0x14   :  { %655 = dma.done.wait [#allocation14], 2048  }
  0x15   :  { %656 = vsyncadd [#allocation14], 4294965248  ;;  %v669_v0 = vmov 0.0   ;;  %v151_v1 = vld [vmem:[#allocation10 + $0x168] sm:$0xff]  ;;  %v153_v2 = vld [vmem:[#allocation10 + $0x178] sm:$0xff]  ;;  %s101_s15 = scalar_lea.vmem [#allocation7], %s771_s0 }
  0x16   :  { %98 = vst [vmem:[#allocation2] sm:$0xff] %v669_v0  ;;  %v148_v3 = vld [vmem:[#allocation10 + $0x150] sm:$0xff]  ;;  %162 = vmatpush.msra.mxu0 %v151_v1  ;;  %202 = vmatpush.msra.mxu2 %v153_v2  ;;  %v150_v4 = vld [vmem:[#allocation10 + $0x160] sm:$0xff]  ;;  %v145_v5 = vld [vmem:[#allocation10 + $0x138] sm:$0xff]  ;;  %s670_s20 = smov [#allocation16]   ;;  %s461_s24 = sshll.u32 %s781_s10, 4  ;;  %s462_s24 = int_to_ptr.hbm [resolvable:$true] %s461_s24 }
  0x17   :  { %99 = vst [vmem:[#allocation4] sm:$0xff] %v669_v0  ;;  %v147_v6 = vld [vmem:[#allocation10 + $0x148] sm:$0xff]  ;;  %v152_v7 = vld [vmem:[#allocation10 + $0x170] sm:$0xff]  ;;  %v149_v8 = vld [vmem:[#allocation10 + $0x158] sm:$0xff]  ;;  %s459_s21 = sshll.u32 %s670_s20, 4  ;;  %s450_s27 = sshll.u32 %s780_s9, 4  ;;  %s460_s21 = int_to_ptr.vmem [resolvable:$true] %s459_s21  ;;  %s451_s27 = int_to_ptr.hbm [resolvable:$true] %s450_s27 }
  0x18   :  { %163 = vmatpush.msra.mxu0 %v148_v3  ;;  %203 = vmatpush.msra.mxu2 %v150_v4  ;;  %v142_v9 = vld [vmem:[#allocation10 + $0x120] sm:$0xff]  ;;  %v144_v10 = vld [vmem:[#allocation10 + $0x130] sm:$0xff]  ;;  %v271_v12 = vld [vmem:[#allocation12 + $0x168] sm:$0xff] }
  0x19   :  { %182 = vmatpush.msra.mxu1 %v152_v7  ;;  %v146_v11 = vld [vmem:[#allocation10 + $0x140] sm:$0xff]  ;;  %v139_v13 = vld [vmem:[#allocation10 + $0x108] sm:$0xff]  ;;  %v141_v14 = vld [vmem:[#allocation10 + $0x118] sm:$0xff]  ;;  %274 = vmatpush.msra.mxu3 %v271_v12 }
  0x1a   :  { %164 = vmatpush.msra.mxu0 %v145_v5  ;;  %204 = vmatpush.msra.mxu2 %v147_v6  ;;  %v268_v15 = vld [vmem:[#allocation12 + $0x150] sm:$0xff]  ;;  %v143_v16 = vld [vmem:[#allocation10 + $0x128] sm:$0xff]  ;;  %v265_v17 = vld [vmem:[#allocation12 + $0x138] sm:$0xff] }
  0x1b   :  { %183 = vmatpush.msra.mxu1 %v149_v8  ;;  %v136_v18 = vld [vmem:[#allocation10 + $0xf0] sm:$0xff]  ;;  %v138_v19 = vld [vmem:[#allocation10 + $0x100] sm:$0xff]  ;;  %275 = vmatpush.msra.mxu3 %v268_v15  ;;  %v133_v22 = vld [vmem:[#allocation10 + $0xd8] sm:$0xff] }
  0x1c   :  { %165 = vmatpush.msra.mxu0 %v142_v9  ;;  %205 = vmatpush.msra.mxu2 %v144_v10  ;;  %v140_v20 = vld [vmem:[#allocation10 + $0x110] sm:$0xff]  ;;  %v262_v21 = vld [vmem:[#allocation12 + $0x120] sm:$0xff]  ;;  %v135_v23 = vld [vmem:[#allocation10 + $0xe8] sm:$0xff] }
  0x1d   :  { %184 = vmatpush.msra.mxu1 %v146_v11  ;;  %276 = vmatpush.msra.mxu3 %v265_v17  ;;  %v137_v24 = vld [vmem:[#allocation10 + $0xf8] sm:$0xff]  ;;  %v259_v25 = vld [vmem:[#allocation12 + $0x108] sm:$0xff]  ;;  %v130_v26 = vld [vmem:[#allocation10 + $0xc0] sm:$0xff] }
  0x1e   :  { %166 = vmatpush.msra.mxu0 %v139_v13  ;;  %206 = vmatpush.msra.mxu2 %v141_v14  ;;  %v132_v27 = vld [vmem:[#allocation10 + $0xd0] sm:$0xff]  ;;  %v134_v28 = vld [vmem:[#allocation10 + $0xe0] sm:$0xff]  ;;  %v127_v30 = vld [vmem:[#allocation10 + $0xa8] sm:$0xff] }
  0x1f   :  { %185 = vmatpush.msra.mxu1 %v143_v16  ;;  %277 = vmatpush.msra.mxu3 %v262_v21  ;;  %v256_v29 = vld [vmem:[#allocation12 + $0xf0] sm:$0xff]  ;;  %v129_v31 = vld [vmem:[#allocation10 + $0xb8] sm:$0xff]  ;;  %v131_v32 = vld [vmem:[#allocation10 + $0xc8] sm:$0xff] }
  0x20   :  { %167 = vmatpush.msra.mxu0 %v136_v18  ;;  %207 = vmatpush.msra.mxu2 %v138_v19  ;;  %v253_v33 = vld [vmem:[#allocation12 + $0xd8] sm:$0xff]  ;;  %v124_v34 = vld [vmem:[#allocation10 + $0x90] sm:$0xff]  ;;  %v126_v35 = vld [vmem:[#allocation10 + $0xa0] sm:$0xff] }
  0x21   :  { %186 = vmatpush.msra.mxu1 %v140_v20  ;;  %278 = vmatpush.msra.mxu3 %v259_v25  ;;  %v128_v36 = vld [vmem:[#allocation10 + $0xb0] sm:$0xff]  ;;  %v250_v37 = vld [vmem:[#allocation12 + $0xc0] sm:$0xff]  ;;  %v121_v38 = vld [vmem:[#allocation10 + $0x78] sm:$0xff] }
  0x22   :  { %168 = vmatpush.msra.mxu0 %v133_v22  ;;  %208 = vmatpush.msra.mxu2 %v135_v23  ;;  %v123_v39 = vld [vmem:[#allocation10 + $0x88] sm:$0xff]  ;;  %v102_v40 = vld [vmem:[%s101_s15] sm:$0x1]  ;;  %v118_v43 = vld [vmem:[#allocation10 + $0x60] sm:$0xff] }
  0x23   :  { %187 = vmatpush.msra.mxu1 %v137_v24  ;;  %279 = vmatpush.msra.mxu3 %v256_v29  ;;  %v125_v41 = vld [vmem:[#allocation10 + $0x98] sm:$0xff]  ;;  %v247_v42 = vld [vmem:[#allocation12 + $0xa8] sm:$0xff]  ;;  %103 = vst [vmem:[#allocation2] sm:$0x1] %v102_v40  ;;  %v120_v44 = vld [vmem:[#allocation10 + $0x70] sm:$0xff] }
  0x24   :  { %169 = vmatpush.msra.mxu0 %v130_v26  ;;  %209 = vmatpush.msra.mxu2 %v132_v27  ;;  %v122_v45 = vld [vmem:[#allocation10 + $0x80] sm:$0xff]  ;;  %v244_v46 = vld [vmem:[#allocation12 + $0x90] sm:$0xff]  ;;  %v115_v47 = vld [vmem:[#allocation10 + $0x48] sm:$0xff] }
  0x25   :  { %188 = vmatpush.msra.mxu1 %v134_v28  ;;  %280 = vmatpush.msra.mxu3 %v253_v33  ;;  %v117_v48 = vld [vmem:[#allocation10 + $0x58] sm:$0xff]  ;;  %v119_v49 = vld [vmem:[#allocation10 + $0x68] sm:$0xff]  ;;  %v112_v51 = vld [vmem:[#allocation10 + $0x30] sm:$0xff] }
  0x26   :  { %170 = vmatpush.msra.mxu0 %v127_v30  ;;  %210 = vmatpush.msra.mxu2 %v129_v31  ;;  %v241_v50 = vld [vmem:[#allocation12 + $0x78] sm:$0xff]  ;;  %v114_v52 = vld [vmem:[#allocation10 + $0x40] sm:$0xff]  ;;  %v116_v53 = vld [vmem:[#allocation10 + $0x50] sm:$0xff] }
  0x27   :  { %189 = vmatpush.msra.mxu1 %v131_v32  ;;  %281 = vmatpush.msra.mxu3 %v250_v37  ;;  %v238_v54 = vld [vmem:[#allocation12 + $0x60] sm:$0xff]  ;;  %v109_v55 = vld [vmem:[#allocation10 + $0x18] sm:$0xff]  ;;  %v111_v56 = vld [vmem:[#allocation10 + $0x28] sm:$0xff] }
  0x28   :  { %171 = vmatpush.msra.mxu0 %v124_v34  ;;  %211 = vmatpush.msra.mxu2 %v126_v35  ;;  %v113_v58 = vld [vmem:[#allocation10 + $0x38] sm:$0xff]  ;;  %v235_v59 = vld [vmem:[#allocation12 + $0x48] sm:$0xff]  ;;  %v106_v60 = vld [vmem:[#allocation10] sm:$0xff] }
  0x29   :  { %190 = vmatpush.msra.mxu1 %v128_v36  ;;  %282 = vmatpush.msra.mxu3 %v247_v42  ;;  %v108_v61 = vld [vmem:[#allocation10 + $0x10] sm:$0xff]  ;;  %v110_v0 = vld [vmem:[#allocation10 + $0x20] sm:$0xff]  ;;  %v269_v2 = vld [vmem:[#allocation12 + $0x158] sm:$0xff] }
  0x2a   :  { %172 = vmatpush.msra.mxu0 %v121_v38  ;;  %212 = vmatpush.msra.mxu2 %v123_v39  ;;  %v104_v57 = vld [vmem:[#allocation2] sm:$0xff]  ;;  %v272_v63 = vld [vmem:[#allocation12 + $0x170] sm:$0xff]  ;;  %v107_v3 = vld [vmem:[#allocation10 + $0x8] sm:$0xff] }
  0x2b   :  { %191 = vmatpush.msra.mxu1 %v125_v41  ;;  %283 = vmatpush.msra.mxu3 %v244_v46  ;;  %v105_v62 = vmax.f32 %v104_v57, 0.0  ;;  %v232_v1 = vld [vmem:[#allocation12 + $0x30] sm:$0xff]  ;;  %v266_v4 = vld [vmem:[#allocation12 + $0x140] sm:$0xff]  ;;  %v229_v5 = vld [vmem:[#allocation12 + $0x18] sm:$0xff] }
  0x2c   :  { %173 = vmatpush.msra.mxu0 %v118_v43  ;;  %213 = vmatpush.msra.mxu2 %v120_v44  ;;  %v273_v6 = vld [vmem:[#allocation12 + $0x178] sm:$0xff]  ;;  %v263_v7 = vld [vmem:[#allocation12 + $0x128] sm:$0xff]  ;;  %v226_v8 = vld [vmem:[#allocation12] sm:$0xff] }
  0x2d   :  { %192 = vmatpush.msra.mxu1 %v122_v45  ;;  %284 = vmatpush.msra.mxu3 %v241_v50  ;;  %v270_v9 = vld [vmem:[#allocation12 + $0x160] sm:$0xff]  ;;  %v260_v10 = vld [vmem:[#allocation12 + $0x110] sm:$0xff]  ;;  %v745_v11 = vld [vmem:[%s779_s8] sm:$0x1] }
  0x2e   :  { %174 = vmatpush.msra.mxu0 %v115_v47  ;;  %214 = vmatpush.msra.mxu2 %v117_v48  ;;  %v267_v12 = vld [vmem:[#allocation12 + $0x148] sm:$0xff]  ;;  %v257_v13 = vld [vmem:[#allocation12 + $0xf8] sm:$0xff]  ;;  %v264_v14 = vld [vmem:[#allocation12 + $0x130] sm:$0xff] }
  0x2f   :  { %193 = vmatpush.msra.mxu1 %v119_v49  ;;  %285 = vmatpush.msra.mxu3 %v238_v54  ;;  %v254_v15 = vld [vmem:[#allocation12 + $0xe0] sm:$0xff]  ;;  %v261_v16 = vld [vmem:[#allocation12 + $0x118] sm:$0xff]  ;;  %v251_v17 = vld [vmem:[#allocation12 + $0xc8] sm:$0xff] }
  0x30   :  { %175 = vmatpush.msra.mxu0 %v112_v51  ;;  %215 = vmatpush.msra.mxu2 %v114_v52  ;;  %v258_v18 = vld [vmem:[#allocation12 + $0x100] sm:$0xff]  ;;  %v248_v19 = vld [vmem:[#allocation12 + $0xb0] sm:$0xff]  ;;  %v255_v20 = vld [vmem:[#allocation12 + $0xe8] sm:$0xff] }
  0x31   :  { %194 = vmatpush.msra.mxu1 %v116_v53  ;;  %286 = vmatpush.msra.mxu3 %v235_v59  ;;  %v245_v21 = vld [vmem:[#allocation12 + $0x98] sm:$0xff]  ;;  %v252_v22 = vld [vmem:[#allocation12 + $0xd0] sm:$0xff]  ;;  %v242_v23 = vld [vmem:[#allocation12 + $0x80] sm:$0xff] }
  0x32   :  { %176 = vmatpush.msra.mxu0 %v109_v55  ;;  %216 = vmatpush.msra.mxu2 %v111_v56  ;;  %v249_v24 = vld [vmem:[#allocation12 + $0xb8] sm:$0xff]  ;;  %v239_v25 = vld [vmem:[#allocation12 + $0x68] sm:$0xff]  ;;  %v246_v26 = vld [vmem:[#allocation12 + $0xa0] sm:$0xff] }
  0x33   :  { %195 = vmatpush.msra.mxu1 %v113_v58  ;;  %287 = vmatpush.msra.mxu3 %v232_v1  ;;  %v236_v27 = vld [vmem:[#allocation12 + $0x50] sm:$0xff]  ;;  %v243_v28 = vld [vmem:[#allocation12 + $0x88] sm:$0xff]  ;;  %v233_v29 = vld [vmem:[#allocation12 + $0x38] sm:$0xff] }
  0x34   :  { %177 = vmatpush.msra.mxu0 %v106_v60  ;;  %217 = vmatpush.msra.mxu2 %v108_v61  ;;  %v240_v30 = vld [vmem:[#allocation12 + $0x70] sm:$0xff]  ;;  %v230_v31 = vld [vmem:[#allocation12 + $0x20] sm:$0xff]  ;;  %v237_v32 = vld [vmem:[#allocation12 + $0x58] sm:$0xff] }
  0x35   :  { %218 = vmatmul.f32.vlgmr.msra.gmra.mxu2 %v105_v62  ;;  %196 = vmatpush.msra.mxu1 %v110_v0  ;;  %v227_v33 = vld [vmem:[#allocation12 + $0x8] sm:$0xff]  ;;  %v234_v34 = vld [vmem:[#allocation12 + $0x40] sm:$0xff]  ;;  %v228_v36 = vld [vmem:[#allocation12 + $0x10] sm:$0xff] }
  0x36   :  { %294 = vmatpush.msrb.mxu0 %v272_v63  ;;  %288 = vmatpush.msra.mxu3 %v229_v5  ;;  %v231_v35 = vld [vmem:[#allocation12 + $0x28] sm:$0xff]  ;;  %v154_v37 = vld [vmem:[%s775_s4] sm:$0x7]  ;;  %v406_v49 = vld [vmem:[#allocation13 + $0x70] sm:$0xff] }
  0x37   :  { %197 = vmatpush.msra.mxu1 %v107_v3  ;;  %178 = vmatmul.f32.vlgmr.msra.gmra.mxu0 %v105_v62  ;;  %v156_v38 = vperm.slane %v154_v37, 0  ;;  %v157_v39 = vperm.slane %v154_v37, 1  ;;  %v158_v41 = vperm.slane %v154_v37, 2  ;;  %v407_v47 = vld [vmem:[#allocation13 + $0x78] sm:$0xff]  ;;  %v405_v52 = vld [vmem:[#allocation13 + $0x68] sm:$0xff]  ;;  %v404_v54 = vld [vmem:[#allocation13 + $0x60] sm:$0xff] }
  0x38   :  { %295 = vmatpush.msrb.mxu0 %v269_v2  ;;  %198 = vmatmul.f32.vlgmr.msra.gmra.mxu1 %v105_v62  ;;  %v403_v55 = vld [vmem:[#allocation13 + $0x58] sm:$0xff]  ;;  %v402_v56 = vld [vmem:[#allocation13 + $0x50] sm:$0xff]  ;;  %v401_v57 = vld [vmem:[#allocation13 + $0x48] sm:$0xff] }
  0x39   :  { %314 = vmatpush.msrb.mxu1 %v273_v6  ;;  %289 = vmatpush.msra.mxu3 %v226_v8  ;;  %v400_v59 = vld [vmem:[#allocation13 + $0x40] sm:$0xff]  ;;  %v399_v61 = vld [vmem:[#allocation13 + $0x38] sm:$0xff]  ;;  %v398_v0 = vld [vmem:[#allocation13 + $0x30] sm:$0xff] }
  0x3a   :  { %296 = vmatpush.msrb.mxu0 %v266_v4  ;;  %290 = vmatmul.f32.vlgmr.msra.gmra.mxu3 %v745_v11  ;;  %v397_v2 = vld [vmem:[#allocation13 + $0x28] sm:$0xff]  ;;  %v396_v4 = vld [vmem:[#allocation13 + $0x20] sm:$0xff]  ;;  %v394_v8 = vld [vmem:[#allocation13 + $0x10] sm:$0xff] }
  0x3b   :  { %315 = vmatpush.msrb.mxu1 %v270_v9  ;;  %412 = vmatpush.msrb.mxu2 %v407_v47 }
  0x3c   :  { %297 = vmatpush.msrb.mxu0 %v263_v7  ;;  %v395_v7 = vld [vmem:[#allocation13 + $0x18] sm:$0xff] }
  0x3d   :  { %316 = vmatpush.msrb.mxu1 %v267_v12  ;;  %413 = vmatpush.msrb.mxu2 %v406_v49 }
  0x3e   :  { %298 = vmatpush.msrb.mxu0 %v260_v10  ;;  %v393_v10 = vld [vmem:[#allocation13 + $0x8] sm:$0xff] }
  0x3f   :  { %317 = vmatpush.msrb.mxu1 %v264_v14  ;;  %414 = vmatpush.msrb.mxu2 %v405_v52  ;;  %v392_v14 = vld [vmem:[#allocation13] sm:$0xff] }
  0x40   :  { %299 = vmatpush.msrb.mxu0 %v257_v13 }
  0x41   :  { %318 = vmatpush.msrb.mxu1 %v261_v16  ;;  %415 = vmatpush.msrb.mxu2 %v404_v54 }
  0x42   :  { %300 = vmatpush.msrb.mxu0 %v254_v15 }
  0x43   :  { %319 = vmatpush.msrb.mxu1 %v258_v18  ;;  %416 = vmatpush.msrb.mxu2 %v403_v55  ;;  %v378_v18 = vld [vmem:[%s776_s5] sm:$0x1] }
  0x44   :  { %301 = vmatpush.msrb.mxu0 %v251_v17 }
  0x45   :  { %320 = vmatpush.msrb.mxu1 %v255_v20  ;;  %417 = vmatpush.msrb.mxu2 %v402_v56 }
  0x46   :  { %302 = vmatpush.msrb.mxu0 %v248_v19 }
  0x47   :  { %321 = vmatpush.msrb.mxu1 %v252_v22  ;;  %418 = vmatpush.msrb.mxu2 %v401_v57 }
  0x48   :  { %303 = vmatpush.msrb.mxu0 %v245_v21 }
  0x49   :  { %322 = vmatpush.msrb.mxu1 %v249_v24  ;;  %419 = vmatpush.msrb.mxu2 %v400_v59 }
  0x4a   :  { %304 = vmatpush.msrb.mxu0 %v242_v23 }
  0x4b   :  { %323 = vmatpush.msrb.mxu1 %v246_v26  ;;  %420 = vmatpush.msrb.mxu2 %v399_v61 }
  0x4c   :  { %305 = vmatpush.msrb.mxu0 %v239_v25 }
  0x4d   :  { %324 = vmatpush.msrb.mxu1 %v243_v28  ;;  %421 = vmatpush.msrb.mxu2 %v398_v0 }
  0x4e   :  { %306 = vmatpush.msrb.mxu0 %v236_v27 }
  0x4f   :  { %325 = vmatpush.msrb.mxu1 %v240_v30  ;;  %422 = vmatpush.msrb.mxu2 %v397_v2 }
  0x50   :  { %307 = vmatpush.msrb.mxu0 %v233_v29 }
  0x51   :  { %326 = vmatpush.msrb.mxu1 %v237_v32  ;;  %423 = vmatpush.msrb.mxu2 %v396_v4 }
  0x52   :  { %308 = vmatpush.msrb.mxu0 %v230_v31 }
  0x53   :  { %327 = vmatpush.msrb.mxu1 %v234_v34  ;;  %424 = vmatpush.msrb.mxu2 %v395_v7 }
  0x54   :  { %309 = vmatpush.msrb.mxu0 %v227_v33 }
  0x55   :  { %310 = vmatmul.f32.vlgmr.msrb.gmra.mxu0 %v745_v11  ;;  %328 = vmatpush.msrb.mxu1 %v231_v35 }
  0x56   :  { %425 = vmatpush.msrb.mxu2 %v394_v8 }
  0x57   :  { %329 = vmatpush.msrb.mxu1 %v228_v36 }
  0x58   :  { %330 = vmatmul.f32.vlgmr.msrb.gmra.mxu1 %v745_v11  ;;  %426 = vmatpush.msrb.mxu2 %v393_v10 }
  0x5a   :  { %427 = vmatpush.msrb.mxu2 %v392_v14 }
  0xb4   :  { %v179_v40 = vpop.f32.mrf.mxu0 }
  0xb5   :  { %v180_v42 = vadd.f32 %v179_v40, %v156_v38  ;;  %v199_v43 = vpop.f32.mrf.mxu1 }
  0xb6   :  { %v200_v44 = vadd.f32 %v199_v43, %v157_v39 }
  0xb7   :  { %222 = vst [vmem:[#allocation3] sm:$0xff] %v180_v42 }
  0xb8   :  { %v219_v45 = vpop.f32.mrf.mxu2  ;;  %223 = vst [vmem:[#allocation3 + $0x8] sm:$0xff] %v200_v44  ;;  %v492_v44 = vld [vmem:[%s778_s7] ss:$0 sm:$0xff]  ;;  %s671_s7 = smov [#allocation15]  }
  0xb9   :  { %v220_v46 = vadd.f32 %v219_v45, %v158_v41  ;;  %s448_s25 = sshll.u32 %s671_s7, 4  ;;  %s449_s25 = int_to_ptr.vmem [resolvable:$true] %s448_s25 }
  0xbb   :  { %224 = vst [vmem:[#allocation3 + $0x10] sm:$0xff] %v220_v46 }
  0xbd   :  { %v291_v48 = vpop.f32.mrf.mxu3 }
  0xc2   :  { %v753_v50 = vld [vmem:[#allocation3] ss:$8 sm:$0x7] }
  0xc3   :  { %v335_v51 = vadd.f32 %v753_v50, %v291_v48  ;;  %v356_v62 = vrot.slane %v753_v50, 1  ;;  %v381_v27 = vrot.slane %v753_v50, 2 }
  0xc5   :  { %v479_v53 = vmul.f32 -1.442695, %v335_v51 }
  0xc7   :  { %493 = vpow2.f32 %v479_v53 }
  0xcd   :  { %v494_v58 = vpop.eup %493 }
  0xce   :  { %v339_v60 = vadd.f32 1.0, %v494_v58 }
  0xd0   :  { %495 = vrcp.f32 %v339_v60  ;;  %v351_v13 = vand.u32 2147483648, %v339_v60  ;;  %vm345_vm0 = vweird.f32 %v339_v60  ;;  %v349_v17 = vand.u32 2147483647, %v339_v60 }
  0xd2   :  { %v311_v63 = vpop.f32.mrf.mxu0  ;;  %v352_v21 = vor.u32 1.1754944e-38, %v351_v13  ;;  %vm350_vm3 = vcmp.eq.f32.partialorder %v349_v17, 8.507059e+37 }
  0xd3   :  { %v358_v1 = vadd.f32 %v356_v62, %v311_v63 }
  0xd5   :  { %v480_v3 = vmul.f32 -1.442695, %v358_v1  ;;  %v331_v16 = vpop.f32.mrf.mxu1 }
  0xd6   :  { %v496_v5 = vpop.eup %495  ;;  %v379_v22 = vadd.f32 %v378_v18, %v331_v16 }
  0xd7   :  { %497 = vpow2.f32 %v480_v3  ;;  %v341_v6 = vmul.f32 %v496_v5, %v339_v60  ;;  %vm346_vm1 = vweird.f32 %v496_v5 }
  0xd8   :  { %vm347_vm2 = vmor %vm345_vm0, %vm346_vm1 }
  0xd9   :  { %v342_v9 = vsub.f32 1.0, %v341_v6 }
  0xdb   :  { %v343_v12 = vmul.f32 %v496_v5, %v342_v9 }
  0xdd   :  { %v498_v15 = vpop.eup %497  ;;  %v344_v20 = vadd.f32 %v496_v5, %v343_v12 }
  0xde   :  { %v362_v19 = vadd.f32 1.0, %v498_v15 }
  0xdf   :  { %v348_v23 = vsel %vm347_vm2, %v496_v5, %v344_v20 }
  0xe0   :  { %499 = vrcp.f32 %v362_v19  ;;  %v353_v24 = vsel %vm350_vm3, %v352_v21, %v348_v23  ;;  %v374_v31 = vand.u32 2147483648, %v362_v19  ;;  %v372_v33 = vand.u32 2147483647, %v362_v19 }
  0xe1   :  { %v380_v25 = vmul.f32 %v379_v22, %v353_v24  ;;  %vm368_vm5 = vweird.f32 %v362_v19 }
  0xe2   :  { %v375_v35 = vor.u32 1.1754944e-38, %v374_v31  ;;  %vm373_vm7 = vcmp.eq.f32.partialorder %v372_v33, 8.507059e+37 }
  0xe3   :  { %v383_v29 = vadd.f32 %v381_v27, %v380_v25 }
  0xe5   :  { %501 = vtanh.f32 %v383_v29 }
  0xe6   :  { %v500_v26 = vpop.eup %499 }
  0xe7   :  { %v364_v28 = vmul.f32 %v500_v26, %v362_v19  ;;  %vm369_vm4 = vweird.f32 %v500_v26 }
  0xe8   :  { %vm370_vm6 = vmor %vm368_vm5, %vm369_vm4 }
  0xe9   :  { %v365_v30 = vsub.f32 1.0, %v364_v28 }
  0xeb   :  { %v366_v32 = vmul.f32 %v500_v26, %v365_v30  ;;  %v502_v39 = vpop.eup %501 }
  0xed   :  { %v367_v34 = vadd.f32 %v500_v26, %v366_v32 }
  0xef   :  { %v371_v36 = vsel %vm370_vm6, %v500_v26, %v367_v34 }
  0xf0   :  { %v376_v37 = vsel %vm373_vm7, %v375_v35, %v371_v36 }
  0xf1   :  { %v385_v38 = vsub.f32 1.0, %v376_v37  ;;  %v387_v41 = vmul.f32 %v376_v37, %v745_v11 }
  0xf3   :  { %v386_v40 = vmul.f32 %v502_v39, %v385_v38 }
  0xf5   :  { %v388_v42 = vadd.f32 %v387_v41, %v386_v40 }
  0xf7   :  { %389 = vst [vmem:[#allocation4] sm:$0x1] %v388_v42 }
  0xf8   :  { %390 = vst [vmem:[#allocation16] sm:$0x1] %v388_v42 }
  0xf9   :  { %464 = dma.vmem_to_hbm [thread:$0]  %s460_s21, 16, %s462_s24, [#allocation17]  }
  0xfe   :  { %v391_v43 = vld [vmem:[#allocation4] sm:$0xff] }
  0xff   :  { %428 = vmatmul.f32.vlgmr.msrb.gmra.mxu2 %v391_v43 }
 0x182   :  { %v429_v45 = vpop.f32.mrf.mxu2 }
 0x183   :  { %v430_v46 = vadd.f32 %v492_v44, %v429_v45 }
 0x185   :  { %432 = vmax.xlane.f32.xlu0 %v430_v46 }
 0x1f8   :  { %v433_v47 = vpop.xlane.xlu0 %432 }
 0x1f9   :  { %v434_v48 = vsub.f32 %v430_v46, %v433_v47 }
 0x1fb   :  { %v435_v49 = vmul.f32 1.442695, %v434_v48 }
 0x1fd   :  { %503 = vpow2.f32 %v435_v49 }
 0x203   :  { %v504_v50 = vpop.eup %503 }
 0x204   :  { %437 = vadd.xlane.f32.xlu0 %v504_v50 }
 0x277   :  { %v438_v11 = vpop.xlane.xlu0 %437 }
 0x278   :  { %505 = vlog2.f32 %v438_v11 }
 0x27e   :  { %v506_v51 = vpop.eup %505 }
 0x27f   :  { %v440_v52 = vmul.f32 0.6931472, %v506_v51 }
 0x281   :  { %v441_v53 = vsub.f32 %v434_v48, %v440_v52 }
 0x283   :  { %442 = vst [vmem:[#allocation15] sm:$0xff] %v441_v53 }
 0x284   :  { %453 = dma.vmem_to_hbm [thread:$0]  %s449_s25, 128, %s451_s27, [#allocation9]  }
 0x285   :  { %657 = dma.done.wait [#allocation9], 128  }
 0x286   :  { %658 = vsyncadd [#allocation9], 4294967168 }
 0x287   :  { %659 = dma.done.wait [#allocation17], 16  }
 0x288   :  { %660 = vsyncadd [#allocation17], 4294967280 }
 0x289   :  { %473 = vsyncpa [#allocation8], 1 }
 0x28a   :  { %474 = vsyncpa [#allocation11], 1 }
 0x28b   :  { %475 = vsyncpa [#allocation14], 1 }
 0x28c   :  { %476 = vsyncpa [#allocation9], 1 }
 0x28d   :  { %477 = vsyncpa [#allocation17], 1 }

</bundles_post_ra>
